<compile_context>
chip_gen: v6e
topology: v6e:2x2x1
jax: 0.10.0
libtpu: 0.0.40
codegen_flags: <defaults>
</compile_context>

<pallas_src>
import jax
import jax.numpy as jnp
from jax.experimental import pallas as pl
from jax.experimental.pallas import tpu as pltpu

HIDDEN = 20
LANES = 128
SUBLANES = 8
N_ACC = 4  # partial accumulators to break the serial add chain


def mlp_kernel(w1_ref, b1_ref, w2_ref, b2_ref, x_ref, o_ref):
    # w1/b1/w2: (20,) f32 in SMEM, b2: (1,) f32 in SMEM.
    # x_ref / o_ref: (block_rows, 128) f32 tiles in VMEM (lane-dense).
    x = x_ref[...]
    accs = [None] * N_ACC
    # Fully unrolled 20-unit MLP on the VPU; no MXU round-trip.
    for h in range(HIDDEN):
        t = w2_ref[h] * jnp.maximum(w1_ref[h] * x + b1_ref[h], 0.0)
        if h == 0:
            t = t + b2_ref[0]  # fold output bias into the first term
        j = h % N_ACC
        accs[j] = t if accs[j] is None else accs[j] + t
    parts = [a for a in accs if a is not None]
    # Tree-combine the partial accumulators.
    while len(parts) > 1:
        parts = [parts[i] + parts[i + 1] for i in range(0, len(parts) - 1, 2)] + (
            [parts[-1]] if len(parts) % 2 else [])
    o_ref[...] = parts[0].astype(o_ref.dtype)


def _choose_block_rows(rows, block_rows):
    """Row-block size: multiple of 8, capped, and >=2 grid steps when rows>=16
    so v7x's two TensorCores can both run the 'parallel' axis."""
    if rows <= SUBLANES:
        return rows  # single full-extent block (no sublane padding needed)
    half = (rows // 2 // SUBLANES) * SUBLANES
    return min(block_rows, max(SUBLANES, half))


def net_forward(x, w1, b1, w2, b2, *, block_rows=1024):
    """x: (N, 1) f32.  w1: (1,20), b1: (20,), w2: (20,1), b2: (1,)."""
    n = x.shape[0]

    # Flatten weights to per-hidden-unit scalar vectors for the SMEM path.
    w1f = jnp.ravel(w1).astype(jnp.float32)   # (20,)
    b1f = jnp.ravel(b1).astype(jnp.float32)   # (20,)
    w2f = jnp.ravel(w2).astype(jnp.float32)   # (20,)
    b2f = jnp.ravel(b2).astype(jnp.float32)   # (1,)

    xf = jnp.ravel(x).astype(jnp.float32)     # free view for f32 (N,1) input

    rows = n // LANES                         # full 128-wide rows
    n_main = rows * LANES
    tail = n - n_main

    out_main_flat = None
    if rows > 0:
        x2 = xf[:n_main].reshape(rows, LANES)   # prefix view, lane-dense
        br = _choose_block_rows(rows, block_rows)
        grid = (pl.cdiv(rows, br),)
        out2 = pl.pallas_call(
            mlp_kernel,
            out_shape=jax.ShapeDtypeStruct((rows, LANES), jnp.float32),
            grid=grid,
            in_specs=[
                pl.BlockSpec(memory_space=pltpu.MemorySpace.SMEM),  # w1 (20,)
                pl.BlockSpec(memory_space=pltpu.MemorySpace.SMEM),  # b1 (20,)
                pl.BlockSpec(memory_space=pltpu.MemorySpace.SMEM),  # w2 (20,)
                pl.BlockSpec(memory_space=pltpu.MemorySpace.SMEM),  # b2 (1,)
                pl.BlockSpec((br, LANES), lambda i: (i, 0)),        # x tile
            ],
            out_specs=pl.BlockSpec((br, LANES), lambda i: (i, 0)),
            compiler_params=pltpu.CompilerParams(
                dimension_semantics=("parallel",)),
            cost_estimate=pl.CostEstimate(
                flops=5 * HIDDEN * n_main,
                transcendentals=0,
                bytes_accessed=8 * n_main + 4 * (3 * HIDDEN + 1)),
        )(w1f, b1f, w2f, b2f, x2)
        out_main_flat = out2.reshape(n_main)

    if tail:
        # <128 leftover scalars: compute in plain JAX (cheaper than padding
        # the whole array and slicing it back).
        x_t = xf[n_main:]
        h_t = jnp.maximum(x_t[:, None] * w1f[None, :] + b1f[None, :], 0.0)
        y_t = h_t @ w2f + b2f[0]
        if out_main_flat is None:
            out_flat = y_t
        else:
            out_flat = jnp.concatenate([out_main_flat, y_t])
    else:
        out_flat = out_main_flat

    return out_flat.reshape(n, 1)


def init_params(key):
    # Deterministic init mimicking torch.nn.Linear's U(-1/sqrt(fan_in), +...)
    k1, k2, k3, k4 = jax.random.split(key, 4)
    bound1 = 1.0  # fan_in = 1
    w1 = jax.random.uniform(k1, (1, HIDDEN), jnp.float32, -bound1, bound1)
    b1 = jax.random.uniform(k2, (HIDDEN,), jnp.float32, -bound1, bound1)
    bound2 = 1.0 / jnp.sqrt(float(HIDDEN))  # fan_in = 20
    w2 = jax.random.uniform(k3, (HIDDEN, 1), jnp.float32, -bound2, bound2)
    b2 = jax.random.uniform(k4, (1,), jnp.float32, -bound2, bound2)
    return w1, b1, w2, b2


if __name__ == "__main__":
    key = jax.random.PRNGKey(0)
    w1, b1, w2, b2 = init_params(key)

    # Same input as the torch spec: torch.unsqueeze(torch.linspace(-1,1,1000), 1)
    n = 1000
    x = jnp.linspace(-1.0, 1.0, n, dtype=jnp.float32)[:, None]  # (N, 1)

    out = net_forward(x, w1, b1, w2, b2)
    jax.block_until_ready(out)

    # Reference check in plain JAX (same math as the torch module).
    ref = jnp.maximum(x @ w1 + b1, 0.0) @ w2 + b2
    assert out.shape == (n, 1)
    assert jnp.allclose(out, ref, atol=1e-5, rtol=1e-5)

    # Also exercise a 128-aligned size (pure-kernel path, no tail).
    n2 = 2048
    x2 = jnp.linspace(-1.0, 1.0, n2, dtype=jnp.float32)[:, None]
    out2 = net_forward(x2, w1, b1, w2, b2)
    jax.block_until_ready(out2)
    ref2 = jnp.maximum(x2 @ w1 + b1, 0.0) @ w2 + b2
    assert jnp.allclose(out2, ref2, atol=1e-5, rtol=1e-5)

    print("KERNEL_OK")
</pallas_src>

<mosaic_0001>
module attributes {stable_mosaic.version = 11 : i64} {
  func.func @mlp_kernel(%arg0: i32, %arg1: memref<20xf32, #tpu.memory_space<smem>>, %arg2: memref<20xf32, #tpu.memory_space<smem>>, %arg3: memref<20xf32, #tpu.memory_space<smem>>, %arg4: memref<1xf32, #tpu.memory_space<smem>>, %arg5: memref<7x128xf32, #tpu.memory_space<vmem>>, %arg6: memref<7x128xf32, #tpu.memory_space<vmem>>) attributes {dimension_semantics = [#tpu.dimension_semantics<parallel>], iteration_bounds = array<i64: 1>, scalar_prefetch = 0 : i64, scratch_operands = 0 : i64, tpu.core_type = #tpu.core_type<tc>, window_params = [{transform_indices = @transform_0, window_bounds = array<i64: 20>}, {transform_indices = @transform_1, window_bounds = array<i64: 20>}, {transform_indices = @transform_2, window_bounds = array<i64: 20>}, {transform_indices = @transform_3, window_bounds = array<i64: 1>}, {transform_indices = @transform_4, window_bounds = array<i64: 7, 128>}, {transform_indices = @transform_5, window_bounds = array<i64: 7, 128>}]} {
    %c0 = arith.constant 0 : index
    %c0_0 = arith.constant 0 : index
    %0 = vector.load %arg5[%c0, %c0_0] : memref<7x128xf32, #tpu.memory_space<vmem>>, vector<7x128xf32>
    %c0_1 = arith.constant 0 : index
    %1 = memref.load %arg3[%c0_1] : memref<20xf32, #tpu.memory_space<smem>>
    %c0_2 = arith.constant 0 : index
    %2 = memref.load %arg1[%c0_2] : memref<20xf32, #tpu.memory_space<smem>>
    %3 = vector.broadcast %2 : f32 to vector<7x128xf32>
    %4 = arith.mulf %3, %0 : vector<7x128xf32>
    %c0_3 = arith.constant 0 : index
    %5 = memref.load %arg2[%c0_3] : memref<20xf32, #tpu.memory_space<smem>>
    %6 = vector.broadcast %5 : f32 to vector<7x128xf32>
    %7 = arith.addf %4, %6 : vector<7x128xf32>
    %cst = arith.constant 0.000000e+00 : f32
    %8 = vector.broadcast %cst : f32 to vector<7x128xf32>
    %9 = arith.maximumf %7, %8 : vector<7x128xf32>
    %10 = vector.broadcast %1 : f32 to vector<7x128xf32>
    %11 = arith.mulf %10, %9 : vector<7x128xf32>
    %c0_4 = arith.constant 0 : index
    %12 = memref.load %arg4[%c0_4] : memref<1xf32, #tpu.memory_space<smem>>
    %13 = vector.broadcast %12 : f32 to vector<7x128xf32>
    %14 = arith.addf %11, %13 : vector<7x128xf32>
    %c1 = arith.constant 1 : index
    %15 = memref.load %arg3[%c1] : memref<20xf32, #tpu.memory_space<smem>>
    %c1_5 = arith.constant 1 : index
    %16 = memref.load %arg1[%c1_5] : memref<20xf32, #tpu.memory_space<smem>>
    %17 = vector.broadcast %16 : f32 to vector<7x128xf32>
    %18 = arith.mulf %17, %0 : vector<7x128xf32>
    %c1_6 = arith.constant 1 : index
    %19 = memref.load %arg2[%c1_6] : memref<20xf32, #tpu.memory_space<smem>>
    %20 = vector.broadcast %19 : f32 to vector<7x128xf32>
    %21 = arith.addf %18, %20 : vector<7x128xf32>
    %cst_7 = arith.constant 0.000000e+00 : f32
    %22 = vector.broadcast %cst_7 : f32 to vector<7x128xf32>
    %23 = arith.maximumf %21, %22 : vector<7x128xf32>
    %24 = vector.broadcast %15 : f32 to vector<7x128xf32>
    %25 = arith.mulf %24, %23 : vector<7x128xf32>
    %c2 = arith.constant 2 : index
    %26 = memref.load %arg3[%c2] : memref<20xf32, #tpu.memory_space<smem>>
    %c2_8 = arith.constant 2 : index
    %27 = memref.load %arg1[%c2_8] : memref<20xf32, #tpu.memory_space<smem>>
    %28 = vector.broadcast %27 : f32 to vector<7x128xf32>
    %29 = arith.mulf %28, %0 : vector<7x128xf32>
    %c2_9 = arith.constant 2 : index
    %30 = memref.load %arg2[%c2_9] : memref<20xf32, #tpu.memory_space<smem>>
    %31 = vector.broadcast %30 : f32 to vector<7x128xf32>
    %32 = arith.addf %29, %31 : vector<7x128xf32>
    %cst_10 = arith.constant 0.000000e+00 : f32
    %33 = vector.broadcast %cst_10 : f32 to vector<7x128xf32>
    %34 = arith.maximumf %32, %33 : vector<7x128xf32>
    %35 = vector.broadcast %26 : f32 to vector<7x128xf32>
    %36 = arith.mulf %35, %34 : vector<7x128xf32>
    %c3 = arith.constant 3 : index
    %37 = memref.load %arg3[%c3] : memref<20xf32, #tpu.memory_space<smem>>
    %c3_11 = arith.constant 3 : index
    %38 = memref.load %arg1[%c3_11] : memref<20xf32, #tpu.memory_space<smem>>
    %39 = vector.broadcast %38 : f32 to vector<7x128xf32>
    %40 = arith.mulf %39, %0 : vector<7x128xf32>
    %c3_12 = arith.constant 3 : index
    %41 = memref.load %arg2[%c3_12] : memref<20xf32, #tpu.memory_space<smem>>
    %42 = vector.broadcast %41 : f32 to vector<7x128xf32>
    %43 = arith.addf %40, %42 : vector<7x128xf32>
    %cst_13 = arith.constant 0.000000e+00 : f32
    %44 = vector.broadcast %cst_13 : f32 to vector<7x128xf32>
    %45 = arith.maximumf %43, %44 : vector<7x128xf32>
    %46 = vector.broadcast %37 : f32 to vector<7x128xf32>
    %47 = arith.mulf %46, %45 : vector<7x128xf32>
    %c4 = arith.constant 4 : index
    %48 = memref.load %arg3[%c4] : memref<20xf32, #tpu.memory_space<smem>>
    %c4_14 = arith.constant 4 : index
    %49 = memref.load %arg1[%c4_14] : memref<20xf32, #tpu.memory_space<smem>>
    %50 = vector.broadcast %49 : f32 to vector<7x128xf32>
    %51 = arith.mulf %50, %0 : vector<7x128xf32>
    %c4_15 = arith.constant 4 : index
    %52 = memref.load %arg2[%c4_15] : memref<20xf32, #tpu.memory_space<smem>>
    %53 = vector.broadcast %52 : f32 to vector<7x128xf32>
    %54 = arith.addf %51, %53 : vector<7x128xf32>
    %cst_16 = arith.constant 0.000000e+00 : f32
    %55 = vector.broadcast %cst_16 : f32 to vector<7x128xf32>
    %56 = arith.maximumf %54, %55 : vector<7x128xf32>
    %57 = vector.broadcast %48 : f32 to vector<7x128xf32>
    %58 = arith.mulf %57, %56 : vector<7x128xf32>
    %59 = arith.addf %14, %58 : vector<7x128xf32>
    %c5 = arith.constant 5 : index
    %60 = memref.load %arg3[%c5] : memref<20xf32, #tpu.memory_space<smem>>
    %c5_17 = arith.constant 5 : index
    %61 = memref.load %arg1[%c5_17] : memref<20xf32, #tpu.memory_space<smem>>
    %62 = vector.broadcast %61 : f32 to vector<7x128xf32>
    %63 = arith.mulf %62, %0 : vector<7x128xf32>
    %c5_18 = arith.constant 5 : index
    %64 = memref.load %arg2[%c5_18] : memref<20xf32, #tpu.memory_space<smem>>
    %65 = vector.broadcast %64 : f32 to vector<7x128xf32>
    %66 = arith.addf %63, %65 : vector<7x128xf32>
    %cst_19 = arith.constant 0.000000e+00 : f32
    %67 = vector.broadcast %cst_19 : f32 to vector<7x128xf32>
    %68 = arith.maximumf %66, %67 : vector<7x128xf32>
    %69 = vector.broadcast %60 : f32 to vector<7x128xf32>
    %70 = arith.mulf %69, %68 : vector<7x128xf32>
    %71 = arith.addf %25, %70 : vector<7x128xf32>
    %c6 = arith.constant 6 : index
    %72 = memref.load %arg3[%c6] : memref<20xf32, #tpu.memory_space<smem>>
    %c6_20 = arith.constant 6 : index
    %73 = memref.load %arg1[%c6_20] : memref<20xf32, #tpu.memory_space<smem>>
    %74 = vector.broadcast %73 : f32 to vector<7x128xf32>
    %75 = arith.mulf %74, %0 : vector<7x128xf32>
    %c6_21 = arith.constant 6 : index
    %76 = memref.load %arg2[%c6_21] : memref<20xf32, #tpu.memory_space<smem>>
    %77 = vector.broadcast %76 : f32 to vector<7x128xf32>
    %78 = arith.addf %75, %77 : vector<7x128xf32>
    %cst_22 = arith.constant 0.000000e+00 : f32
    %79 = vector.broadcast %cst_22 : f32 to vector<7x128xf32>
    %80 = arith.maximumf %78, %79 : vector<7x128xf32>
    %81 = vector.broadcast %72 : f32 to vector<7x128xf32>
    %82 = arith.mulf %81, %80 : vector<7x128xf32>
    %83 = arith.addf %36, %82 : vector<7x128xf32>
    %c7 = arith.constant 7 : index
    %84 = memref.load %arg3[%c7] : memref<20xf32, #tpu.memory_space<smem>>
    %c7_23 = arith.constant 7 : index
    %85 = memref.load %arg1[%c7_23] : memref<20xf32, #tpu.memory_space<smem>>
    %86 = vector.broadcast %85 : f32 to vector<7x128xf32>
    %87 = arith.mulf %86, %0 : vector<7x128xf32>
    %c7_24 = arith.constant 7 : index
    %88 = memref.load %arg2[%c7_24] : memref<20xf32, #tpu.memory_space<smem>>
    %89 = vector.broadcast %88 : f32 to vector<7x128xf32>
    %90 = arith.addf %87, %89 : vector<7x128xf32>
    %cst_25 = arith.constant 0.000000e+00 : f32
    %91 = vector.broadcast %cst_25 : f32 to vector<7x128xf32>
    %92 = arith.maximumf %90, %91 : vector<7x128xf32>
    %93 = vector.broadcast %84 : f32 to vector<7x128xf32>
    %94 = arith.mulf %93, %92 : vector<7x128xf32>
    %95 = arith.addf %47, %94 : vector<7x128xf32>
    %c8 = arith.constant 8 : index
    %96 = memref.load %arg3[%c8] : memref<20xf32, #tpu.memory_space<smem>>
    %c8_26 = arith.constant 8 : index
    %97 = memref.load %arg1[%c8_26] : memref<20xf32, #tpu.memory_space<smem>>
    %98 = vector.broadcast %97 : f32 to vector<7x128xf32>
    %99 = arith.mulf %98, %0 : vector<7x128xf32>
    %c8_27 = arith.constant 8 : index
    %100 = memref.load %arg2[%c8_27] : memref<20xf32, #tpu.memory_space<smem>>
    %101 = vector.broadcast %100 : f32 to vector<7x128xf32>
    %102 = arith.addf %99, %101 : vector<7x128xf32>
    %cst_28 = arith.constant 0.000000e+00 : f32
    %103 = vector.broadcast %cst_28 : f32 to vector<7x128xf32>
    %104 = arith.maximumf %102, %103 : vector<7x128xf32>
    %105 = vector.broadcast %96 : f32 to vector<7x128xf32>
    %106 = arith.mulf %105, %104 : vector<7x128xf32>
    %107 = arith.addf %59, %106 : vector<7x128xf32>
    %c9 = arith.constant 9 : index
    %108 = memref.load %arg3[%c9] : memref<20xf32, #tpu.memory_space<smem>>
    %c9_29 = arith.constant 9 : index
    %109 = memref.load %arg1[%c9_29] : memref<20xf32, #tpu.memory_space<smem>>
    %110 = vector.broadcast %109 : f32 to vector<7x128xf32>
    %111 = arith.mulf %110, %0 : vector<7x128xf32>
    %c9_30 = arith.constant 9 : index
    %112 = memref.load %arg2[%c9_30] : memref<20xf32, #tpu.memory_space<smem>>
    %113 = vector.broadcast %112 : f32 to vector<7x128xf32>
    %114 = arith.addf %111, %113 : vector<7x128xf32>
    %cst_31 = arith.constant 0.000000e+00 : f32
    %115 = vector.broadcast %cst_31 : f32 to vector<7x128xf32>
    %116 = arith.maximumf %114, %115 : vector<7x128xf32>
    %117 = vector.broadcast %108 : f32 to vector<7x128xf32>
    %118 = arith.mulf %117, %116 : vector<7x128xf32>
    %119 = arith.addf %71, %118 : vector<7x128xf32>
    %c10 = arith.constant 10 : index
    %120 = memref.load %arg3[%c10] : memref<20xf32, #tpu.memory_space<smem>>
    %c10_32 = arith.constant 10 : index
    %121 = memref.load %arg1[%c10_32] : memref<20xf32, #tpu.memory_space<smem>>
    %122 = vector.broadcast %121 : f32 to vector<7x128xf32>
    %123 = arith.mulf %122, %0 : vector<7x128xf32>
    %c10_33 = arith.constant 10 : index
    %124 = memref.load %arg2[%c10_33] : memref<20xf32, #tpu.memory_space<smem>>
    %125 = vector.broadcast %124 : f32 to vector<7x128xf32>
    %126 = arith.addf %123, %125 : vector<7x128xf32>
    %cst_34 = arith.constant 0.000000e+00 : f32
    %127 = vector.broadcast %cst_34 : f32 to vector<7x128xf32>
    %128 = arith.maximumf %126, %127 : vector<7x128xf32>
    %129 = vector.broadcast %120 : f32 to vector<7x128xf32>
    %130 = arith.mulf %129, %128 : vector<7x128xf32>
    %131 = arith.addf %83, %130 : vector<7x128xf32>
    %c11 = arith.constant 11 : index
    %132 = memref.load %arg3[%c11] : memref<20xf32, #tpu.memory_space<smem>>
    %c11_35 = arith.constant 11 : index
    %133 = memref.load %arg1[%c11_35] : memref<20xf32, #tpu.memory_space<smem>>
    %134 = vector.broadcast %133 : f32 to vector<7x128xf32>
    %135 = arith.mulf %134, %0 : vector<7x128xf32>
    %c11_36 = arith.constant 11 : index
    %136 = memref.load %arg2[%c11_36] : memref<20xf32, #tpu.memory_space<smem>>
    %137 = vector.broadcast %136 : f32 to vector<7x128xf32>
    %138 = arith.addf %135, %137 : vector<7x128xf32>
    %cst_37 = arith.constant 0.000000e+00 : f32
    %139 = vector.broadcast %cst_37 : f32 to vector<7x128xf32>
    %140 = arith.maximumf %138, %139 : vector<7x128xf32>
    %141 = vector.broadcast %132 : f32 to vector<7x128xf32>
    %142 = arith.mulf %141, %140 : vector<7x128xf32>
    %143 = arith.addf %95, %142 : vector<7x128xf32>
    %c12 = arith.constant 12 : index
    %144 = memref.load %arg3[%c12] : memref<20xf32, #tpu.memory_space<smem>>
    %c12_38 = arith.constant 12 : index
    %145 = memref.load %arg1[%c12_38] : memref<20xf32, #tpu.memory_space<smem>>
    %146 = vector.broadcast %145 : f32 to vector<7x128xf32>
    %147 = arith.mulf %146, %0 : vector<7x128xf32>
    %c12_39 = arith.constant 12 : index
    %148 = memref.load %arg2[%c12_39] : memref<20xf32, #tpu.memory_space<smem>>
    %149 = vector.broadcast %148 : f32 to vector<7x128xf32>
    %150 = arith.addf %147, %149 : vector<7x128xf32>
    %cst_40 = arith.constant 0.000000e+00 : f32
    %151 = vector.broadcast %cst_40 : f32 to vector<7x128xf32>
    %152 = arith.maximumf %150, %151 : vector<7x128xf32>
    %153 = vector.broadcast %144 : f32 to vector<7x128xf32>
    %154 = arith.mulf %153, %152 : vector<7x128xf32>
    %155 = arith.addf %107, %154 : vector<7x128xf32>
    %c13 = arith.constant 13 : index
    %156 = memref.load %arg3[%c13] : memref<20xf32, #tpu.memory_space<smem>>
    %c13_41 = arith.constant 13 : index
    %157 = memref.load %arg1[%c13_41] : memref<20xf32, #tpu.memory_space<smem>>
    %158 = vector.broadcast %157 : f32 to vector<7x128xf32>
    %159 = arith.mulf %158, %0 : vector<7x128xf32>
    %c13_42 = arith.constant 13 : index
    %160 = memref.load %arg2[%c13_42] : memref<20xf32, #tpu.memory_space<smem>>
    %161 = vector.broadcast %160 : f32 to vector<7x128xf32>
    %162 = arith.addf %159, %161 : vector<7x128xf32>
    %cst_43 = arith.constant 0.000000e+00 : f32
    %163 = vector.broadcast %cst_43 : f32 to vector<7x128xf32>
    %164 = arith.maximumf %162, %163 : vector<7x128xf32>
    %165 = vector.broadcast %156 : f32 to vector<7x128xf32>
    %166 = arith.mulf %165, %164 : vector<7x128xf32>
    %167 = arith.addf %119, %166 : vector<7x128xf32>
    %c14 = arith.constant 14 : index
    %168 = memref.load %arg3[%c14] : memref<20xf32, #tpu.memory_space<smem>>
    %c14_44 = arith.constant 14 : index
    %169 = memref.load %arg1[%c14_44] : memref<20xf32, #tpu.memory_space<smem>>
    %170 = vector.broadcast %169 : f32 to vector<7x128xf32>
    %171 = arith.mulf %170, %0 : vector<7x128xf32>
    %c14_45 = arith.constant 14 : index
    %172 = memref.load %arg2[%c14_45] : memref<20xf32, #tpu.memory_space<smem>>
    %173 = vector.broadcast %172 : f32 to vector<7x128xf32>
    %174 = arith.addf %171, %173 : vector<7x128xf32>
    %cst_46 = arith.constant 0.000000e+00 : f32
    %175 = vector.broadcast %cst_46 : f32 to vector<7x128xf32>
    %176 = arith.maximumf %174, %175 : vector<7x128xf32>
    %177 = vector.broadcast %168 : f32 to vector<7x128xf32>
    %178 = arith.mulf %177, %176 : vector<7x128xf32>
    %179 = arith.addf %131, %178 : vector<7x128xf32>
    %c15 = arith.constant 15 : index
    %180 = memref.load %arg3[%c15] : memref<20xf32, #tpu.memory_space<smem>>
    %c15_47 = arith.constant 15 : index
    %181 = memref.load %arg1[%c15_47] : memref<20xf32, #tpu.memory_space<smem>>
    %182 = vector.broadcast %181 : f32 to vector<7x128xf32>
    %183 = arith.mulf %182, %0 : vector<7x128xf32>
    %c15_48 = arith.constant 15 : index
    %184 = memref.load %arg2[%c15_48] : memref<20xf32, #tpu.memory_space<smem>>
    %185 = vector.broadcast %184 : f32 to vector<7x128xf32>
    %186 = arith.addf %183, %185 : vector<7x128xf32>
    %cst_49 = arith.constant 0.000000e+00 : f32
    %187 = vector.broadcast %cst_49 : f32 to vector<7x128xf32>
    %188 = arith.maximumf %186, %187 : vector<7x128xf32>
    %189 = vector.broadcast %180 : f32 to vector<7x128xf32>
    %190 = arith.mulf %189, %188 : vector<7x128xf32>
    %191 = arith.addf %143, %190 : vector<7x128xf32>
    %c16 = arith.constant 16 : index
    %192 = memref.load %arg3[%c16] : memref<20xf32, #tpu.memory_space<smem>>
    %c16_50 = arith.constant 16 : index
    %193 = memref.load %arg1[%c16_50] : memref<20xf32, #tpu.memory_space<smem>>
    %194 = vector.broadcast %193 : f32 to vector<7x128xf32>
    %195 = arith.mulf %194, %0 : vector<7x128xf32>
    %c16_51 = arith.constant 16 : index
    %196 = memref.load %arg2[%c16_51] : memref<20xf32, #tpu.memory_space<smem>>
    %197 = vector.broadcast %196 : f32 to vector<7x128xf32>
    %198 = arith.addf %195, %197 : vector<7x128xf32>
    %cst_52 = arith.constant 0.000000e+00 : f32
    %199 = vector.broadcast %cst_52 : f32 to vector<7x128xf32>
    %200 = arith.maximumf %198, %199 : vector<7x128xf32>
    %201 = vector.broadcast %192 : f32 to vector<7x128xf32>
    %202 = arith.mulf %201, %200 : vector<7x128xf32>
    %203 = arith.addf %155, %202 : vector<7x128xf32>
    %c17 = arith.constant 17 : index
    %204 = memref.load %arg3[%c17] : memref<20xf32, #tpu.memory_space<smem>>
    %c17_53 = arith.constant 17 : index
    %205 = memref.load %arg1[%c17_53] : memref<20xf32, #tpu.memory_space<smem>>
    %206 = vector.broadcast %205 : f32 to vector<7x128xf32>
    %207 = arith.mulf %206, %0 : vector<7x128xf32>
    %c17_54 = arith.constant 17 : index
    %208 = memref.load %arg2[%c17_54] : memref<20xf32, #tpu.memory_space<smem>>
    %209 = vector.broadcast %208 : f32 to vector<7x128xf32>
    %210 = arith.addf %207, %209 : vector<7x128xf32>
    %cst_55 = arith.constant 0.000000e+00 : f32
    %211 = vector.broadcast %cst_55 : f32 to vector<7x128xf32>
    %212 = arith.maximumf %210, %211 : vector<7x128xf32>
    %213 = vector.broadcast %204 : f32 to vector<7x128xf32>
    %214 = arith.mulf %213, %212 : vector<7x128xf32>
    %215 = arith.addf %167, %214 : vector<7x128xf32>
    %c18 = arith.constant 18 : index
    %216 = memref.load %arg3[%c18] : memref<20xf32, #tpu.memory_space<smem>>
    %c18_56 = arith.constant 18 : index
    %217 = memref.load %arg1[%c18_56] : memref<20xf32, #tpu.memory_space<smem>>
    %218 = vector.broadcast %217 : f32 to vector<7x128xf32>
    %219 = arith.mulf %218, %0 : vector<7x128xf32>
    %c18_57 = arith.constant 18 : index
    %220 = memref.load %arg2[%c18_57] : memref<20xf32, #tpu.memory_space<smem>>
    %221 = vector.broadcast %220 : f32 to vector<7x128xf32>
    %222 = arith.addf %219, %221 : vector<7x128xf32>
    %cst_58 = arith.constant 0.000000e+00 : f32
    %223 = vector.broadcast %cst_58 : f32 to vector<7x128xf32>
    %224 = arith.maximumf %222, %223 : vector<7x128xf32>
    %225 = vector.broadcast %216 : f32 to vector<7x128xf32>
    %226 = arith.mulf %225, %224 : vector<7x128xf32>
    %227 = arith.addf %179, %226 : vector<7x128xf32>
    %c19 = arith.constant 19 : index
    %228 = memref.load %arg3[%c19] : memref<20xf32, #tpu.memory_space<smem>>
    %c19_59 = arith.constant 19 : index
    %229 = memref.load %arg1[%c19_59] : memref<20xf32, #tpu.memory_space<smem>>
    %230 = vector.broadcast %229 : f32 to vector<7x128xf32>
    %231 = arith.mulf %230, %0 : vector<7x128xf32>
    %c19_60 = arith.constant 19 : index
    %232 = memref.load %arg2[%c19_60] : memref<20xf32, #tpu.memory_space<smem>>
    %233 = vector.broadcast %232 : f32 to vector<7x128xf32>
    %234 = arith.addf %231, %233 : vector<7x128xf32>
    %cst_61 = arith.constant 0.000000e+00 : f32
    %235 = vector.broadcast %cst_61 : f32 to vector<7x128xf32>
    %236 = arith.maximumf %234, %235 : vector<7x128xf32>
    %237 = vector.broadcast %228 : f32 to vector<7x128xf32>
    %238 = arith.mulf %237, %236 : vector<7x128xf32>
    %239 = arith.addf %191, %238 : vector<7x128xf32>
    %240 = arith.addf %203, %215 : vector<7x128xf32>
    %241 = arith.addf %227, %239 : vector<7x128xf32>
    %242 = arith.addf %240, %241 : vector<7x128xf32>
    %c0_62 = arith.constant 0 : index
    %c0_63 = arith.constant 0 : index
    %243 = vector.load %arg6[%c0_62, %c0_63] : memref<7x128xf32, #tpu.memory_space<vmem>>, vector<7x128xf32>
    tpu.vector_store %arg6[%c0_62, %c0_63], %242 {strides = array<i32>} : memref<7x128xf32, #tpu.memory_space<vmem>>, vector<7x128xf32>,
    return
  }
  func.func @transform_0(%arg0: i32) -> i32 {
    %c0_i32 = arith.constant 0 : i32
    %c0_i32_0 = arith.constant 0 : i32
    return %c0_i32 : i32
  }
  func.func @transform_1(%arg0: i32) -> i32 {
    %c0_i32 = arith.constant 0 : i32
    %c0_i32_0 = arith.constant 0 : i32
    return %c0_i32 : i32
  }
  func.func @transform_2(%arg0: i32) -> i32 {
    %c0_i32 = arith.constant 0 : i32
    %c0_i32_0 = arith.constant 0 : i32
    return %c0_i32 : i32
  }
  func.func @transform_3(%arg0: i32) -> i32 {
    %c0_i32 = arith.constant 0 : i32
    %c0_i32_0 = arith.constant 0 : i32
    return %c0_i32 : i32
  }
  func.func @transform_4(%arg0: i32) -> (i32, i32) {
    %c0_i32 = arith.constant 0 : i32
    %c0_i32_0 = arith.constant 0 : i32
    return %arg0, %c0_i32 : i32, i32
  }
  func.func @transform_5(%arg0: i32) -> (i32, i32) {
    %c0_i32 = arith.constant 0 : i32
    %c0_i32_0 = arith.constant 0 : i32
    return %arg0, %c0_i32 : i32, i32
  }
}

</mosaic_0001>

<bundles_post_ra>
// kernel: tpu_custom_call.1
= control target key start
LH: loop header
LB: loop body
LE: loop exit
PB: predicated region body
PF: predicated region fallthrough
CT: control target
= control target key end

     0   :  { %11 = vsyncpa [#allocation6], 0  ;;  %s688_s0 = inlined_call_operand.vmem [shape: f32[20], index: 0, kind: input, shape index: {}]   ;;  %s689_s1 = inlined_call_operand.vmem [shape: f32[20], index: 1, kind: input, shape index: {}]   ;;  %s690_s2 = inlined_call_operand.vmem [shape: f32[20], index: 2, kind: input, shape index: {}]   ;;  %s691_s3 = inlined_call_operand.<no memory space> [shape: f32[1], index: 3, kind: input, shape index: {}]   ;;  %s692_s4 = inlined_call_operand.hbm [shape: f32[7,128], index: 4, kind: input, shape index: {}]   ;;  %s693_s5 = inlined_call_operand.hbm [shape: f32[7,128], index: 5, kind: output, shape index: {}]  }
   0x1   :  { %12 = vsyncpa [#allocation8], 0 }
   0x2   :  { %13 = vsyncpa [#allocation4], 0  ;;  %s31_s20 = sshll.u32 %s689_s1, 4  ;;  %s32_s20 = int_to_ptr.vmem [resolvable:$true] %s31_s20 }
   0x3   :  { %14 = vsyncpa [#allocation5], 0  ;;  %s21_s23 = sshll.u32 %s688_s0, 4  ;;  %s373_s24 = scalar_lea.vmem %s32_s20, 16  ;;  %s22_s23 = int_to_ptr.vmem [resolvable:$true] %s21_s23 }
   0x4   :  { %p374_p0 = scmp.ne.s32.totalorder %s32_s20, %s373_s24  ;;  %p378_p1 = scmp.lt.s32.totalorder %s32_s20, %s32_s20 }
   0x5   :  { %p379_p2 = scmp.lt.s32.totalorder %s373_s24, %s373_s24 }
   0x7   :  { %p380_p3 = por %p379_p2, %p378_p1 }
   0x9   :  { %p381_p4 = pnand %p380_p3, %p374_p0 }
   0xb   :  { %384 = shalt.err (!%p381_p4)
}
   0xc   :  { %s457_s25 = smov [#allocation7]   ;;  %s385_s26 = scalar_lea.vmem %s22_s23, 16 }
   0xd   :  { %34 = dma.vmem_to_smem %s32_s20, 16, %s457_s25, [#allocation8]  }
   0xe   :  { %p386_p5 = scmp.ne.s32.totalorder %s22_s23, %s385_s26  ;;  %p390_p6 = scmp.lt.s32.totalorder %s22_s23, %s22_s23 }
   0xf   :  { %p391_p7 = scmp.lt.s32.totalorder %s385_s26, %s385_s26 }
  0x11   :  { %p392_p8 = por %p391_p7, %p390_p6 }
  0x13   :  { %p393_p9 = pnand %p392_p8, %p386_p5 }
  0x15   :  { %396 = shalt.err (!%p393_p9)
}
  0x16   :  { %s458_s1 = smov [#allocation3]   ;;  %s41_s28 = sshll.u32 %s690_s2, 4  ;;  %s42_s28 = int_to_ptr.vmem [resolvable:$true] %s41_s28 }
  0x17   :  { %24 = dma.vmem_to_smem %s22_s23, 16, %s458_s1, [#allocation6]  }
  0x18   :  { %s397_s29 = scalar_lea.vmem %s42_s28, 16  ;;  %p402_p11 = scmp.lt.s32.totalorder %s42_s28, %s42_s28 }
  0x19   :  { %p398_p10 = scmp.ne.s32.totalorder %s42_s28, %s397_s29  ;;  %p403_p12 = scmp.lt.s32.totalorder %s397_s29, %s397_s29 }
  0x1b   :  { %p404_p13 = por %p403_p12, %p402_p11 }
  0x1d   :  { %p405_p0 = pnand %p404_p13, %p398_p10 }
  0x1f   :  { %408 = shalt.err (!%p405_p0)
}
  0x20   :  { %s459_s30 = smov [#allocation9]   ;;  %s460_s6 = smov [#allocation10]  }
  0x21   :  { %44 = dma.vmem_to_smem %s42_s28, 16, %s459_s30, [#allocation8]  }
  0x22   :  { %s53_s7 = sshll.u32 %s460_s6, 4  ;;  %s54_s7 = int_to_ptr.vmem [resolvable:$true] %s53_s7 }
  0x23   :  { %s417_s8 = scalar_lea.vmem %s54_s7, 128  ;;  %p422_p2 = scmp.lt.s32.totalorder %s54_s7, %s54_s7 }
  0x24   :  { %p418_p1 = scmp.ne.s32.totalorder %s54_s7, %s417_s8  ;;  %p423_p3 = scmp.lt.s32.totalorder %s417_s8, %s417_s8 }
  0x26   :  { %p424_p4 = por %p423_p3, %p422_p2 }
  0x28   :  { %p425_p5 = pnand %p424_p4, %p418_p1 }
  0x2a   :  { %428 = shalt.err (!%p425_p5)
}
  0x2b   :  { %56 = dma.hbm_to_vmem [thread:$0]  %s692_s4, 128, %s54_s7, [#allocation4]  }
  0x2c   :  { %449 = dma.done.wait [#allocation6], 16  }
  0x2d   :  { %450 = vsyncadd [#allocation6], 4294967280 }
  0x2e   :  { %451 = dma.done.wait [#allocation8], 32  }
  0x2f   :  { %452 = vsyncadd [#allocation8], 4294967264 }
  0x30   :  { %453 = dma.done.wait [#allocation4], 128  }
  0x31   :  { %454 = vsyncadd [#allocation4], 4294967168 }
  0x32   :  { %69 = sfence }
  0x33   :  { %s504_s10 = sld [smem:[#allocation9]]  ;;  %v536_v0 = vld [vmem:[#allocation10] sm:$0x7f]  ;;  %v82_v27 = vstv %s691_s3 }
  0x34   :  { %s72_s11 = sld [smem:[#allocation3]] }
  0x35   :  { %s75_s12 = sld [smem:[#allocation7]] }
  0x36   :  { %s506_s13 = sld [smem:[#allocation9 + $0x1]] }
  0x37   :  { %s312_s14 = sld [smem:[#allocation3 + $0x1]] }
  0x38   :  { %s508_s15 = sld [smem:[#allocation7 + $0x1]] }
  0x39   :  { %s510_s16 = sld [smem:[#allocation9 + $0x2]]  ;;  %v79_v15 = vstv %s504_s10 }
  0x3a   :  { %s512_s17 = sld [smem:[#allocation3 + $0x2]]  ;;  %v73_v1 = vstv %s72_s11 }
  0x3b   :  { %s514_s4 = sld [smem:[#allocation7 + $0x2]]  ;;  %v74_v2 = vmul.f32 %v73_v1, %v536_v0  ;;  %v76_v3 = vstv %s75_s12 }
  0x3c   :  { %s516_s18 = sld [smem:[#allocation9 + $0x3]]  ;;  %v92_v29 = vstv %s506_s13 }
  0x3d   :  { %s518_s19 = sld [smem:[#allocation3 + $0x3]]  ;;  %v86_v4 = vstv %s312_s14  ;;  %v77_v6 = vadd.f32 %v76_v3, %v74_v2 }
  0x3e   :  { %s520_s20 = sld [smem:[#allocation7 + $0x3]]  ;;  %v87_v7 = vmul.f32 %v86_v4, %v536_v0  ;;  %v89_v8 = vstv %s508_s15 }
  0x3f   :  { %s522_s21 = sld [smem:[#allocation9 + $0x4]]  ;;  %v78_v12 = vmax.f32 %v77_v6, 0.0  ;;  %v102_v35 = vstv %s510_s16 }
  0x40   :  { %s524_s22 = sld [smem:[#allocation3 + $0x4]]  ;;  %v96_v5 = vstv %s512_s17  ;;  %v90_v16 = vadd.f32 %v89_v8, %v87_v7 }
  0x41   :  { %s526_s23 = sld [smem:[#allocation7 + $0x4]]  ;;  %v97_v9 = vmul.f32 %v96_v5, %v536_v0  ;;  %v99_v10 = vstv %s514_s4  ;;  %v80_v24 = vmul.f32 %v79_v15, %v78_v12 }
  0x42   :  { %s528_s24 = sld [smem:[#allocation9 + $0x5]]  ;;  %v91_v28 = vmax.f32 %v90_v16, 0.0  ;;  %v112_v40 = vstv %s516_s18 }
  0x43   :  { %s530_s25 = sld [smem:[#allocation3 + $0x5]]  ;;  %v106_v13 = vstv %s518_s19  ;;  %v100_v17 = vadd.f32 %v99_v10, %v97_v9  ;;  %v83_v39 = vadd.f32 %v82_v27, %v80_v24 }
  0x44   :  { %s532_s26 = sld [smem:[#allocation7 + $0x5]]  ;;  %v107_v20 = vmul.f32 %v106_v13, %v536_v0  ;;  %v109_v25 = vstv %s520_s20  ;;  %v93_v42 = vmul.f32 %v92_v29, %v91_v28 }
  0x45   :  { %s534_s1 = sld [smem:[#allocation9 + $0x6]]  ;;  %v101_v31 = vmax.f32 %v100_v17, 0.0  ;;  %v122_v48 = vstv %s522_s21 }
  0x46   :  { %s538_s0 = sld [smem:[#allocation3 + $0x6]]  ;;  %v116_v11 = vstv %s524_s22  ;;  %v110_v36 = vadd.f32 %v109_v25, %v107_v20 }
  0x47   :  { %s540_s27 = sld [smem:[#allocation7 + $0x6]]  ;;  %v117_v18 = vmul.f32 %v116_v11, %v536_v0  ;;  %v119_v21 = vstv %s526_s23  ;;  %v103_v46 = vmul.f32 %v102_v35, %v101_v31 }
  0x48   :  { %s542_s28 = sld [smem:[#allocation9 + $0x7]]  ;;  %v111_v50 = vmax.f32 %v110_v36, 0.0  ;;  %v133_v54 = vstv %s528_s24 }
  0x49   :  { %s545_s29 = sld [smem:[#allocation3 + $0x7]]  ;;  %v127_v14 = vstv %s530_s25  ;;  %v120_v32 = vadd.f32 %v119_v21, %v117_v18 }
  0x4a   :  { %s547_s30 = sld [smem:[#allocation7 + $0x7]]  ;;  %v128_v22 = vmul.f32 %v127_v14, %v536_v0  ;;  %v130_v26 = vstv %s532_s26  ;;  %v113_v11 = vmul.f32 %v112_v40, %v111_v50 }
  0x4b   :  { %s549_s6 = sld [smem:[#allocation9 + $0x8]]  ;;  %v121_v47 = vmax.f32 %v120_v32, 0.0  ;;  %v144_v63 = vstv %s534_s1 }
  0x4c   :  { %s552_s7 = sld [smem:[#allocation3 + $0x8]]  ;;  %v138_v19 = vstv %s538_s0  ;;  %v131_v37 = vadd.f32 %v130_v26, %v128_v22 }
  0x4d   :  { %s554_s8 = sld [smem:[#allocation7 + $0x8]]  ;;  %v139_v30 = vmul.f32 %v138_v19, %v536_v0  ;;  %v141_v33 = vstv %s540_s27  ;;  %v123_v62 = vmul.f32 %v122_v48, %v121_v47 }
  0x4e   :  { %s557_s2 = sld [smem:[#allocation9 + $0x9]]  ;;  %v132_v51 = vmax.f32 %v131_v37, 0.0  ;;  %v155_v4 = vstv %s542_s28 }
  0x4f   :  { %s561_s9 = sld [smem:[#allocation3 + $0x9]]  ;;  %v149_v23 = vstv %s545_s29  ;;  %v142_v43 = vadd.f32 %v141_v33, %v139_v30  ;;  %v124_v15 = vadd.f32 %v123_v62, %v83_v39 }
  0x50   :  { %s565_s11 = sld [smem:[#allocation7 + $0x9]]  ;;  %v150_v34 = vmul.f32 %v149_v23, %v536_v0  ;;  %v152_v38 = vstv %s547_s30  ;;  %v134_v3 = vmul.f32 %v133_v54, %v132_v51 }
  0x51   :  { %s569_s12 = sld [smem:[#allocation9 + $0xa]]  ;;  %v143_v58 = vmax.f32 %v142_v43, 0.0  ;;  %v166_v21 = vstv %s549_s6 }
  0x52   :  { %s572_s14 = sld [smem:[#allocation3 + $0xa]]  ;;  %v160_v41 = vstv %s552_s7  ;;  %v153_v49 = vadd.f32 %v152_v38, %v150_v34  ;;  %v135_v19 = vadd.f32 %v134_v3, %v93_v42 }
  0x53   :  { %s576_s15 = sld [smem:[#allocation7 + $0xa]]  ;;  %v161_v52 = vmul.f32 %v160_v41, %v536_v0  ;;  %v163_v55 = vstv %s554_s8  ;;  %v145_v12 = vmul.f32 %v144_v63, %v143_v58 }
  0x54   :  { %s582_s17 = sld [smem:[#allocation9 + $0xb]]  ;;  %v154_v1 = vmax.f32 %v153_v49, 0.0  ;;  %v177_v24 = vstv %s557_s2 }
  0x55   :  { %s586_s10 = sld [smem:[#allocation3 + $0xb]]  ;;  %v171_v44 = vstv %s561_s9  ;;  %v164_v5 = vadd.f32 %v163_v55, %v161_v52  ;;  %v146_v27 = vadd.f32 %v145_v12, %v103_v46 }
  0x56   :  { %s593_s22 = sld [smem:[#allocation7 + $0xb]]  ;;  %v172_v56 = vmul.f32 %v171_v44, %v536_v0  ;;  %v174_v59 = vstv %s565_s11  ;;  %v156_v16 = vmul.f32 %v155_v4, %v154_v1 }
  0x57   :  { %s597_s20 = sld [smem:[#allocation9 + $0xc]]  ;;  %v165_v20 = vmax.f32 %v164_v5, 0.0  ;;  %v188_v28 = vstv %s569_s12 }
  0x58   :  { %s601_s3 = sld [smem:[#allocation3 + $0xc]]  ;;  %v182_v45 = vstv %s572_s14  ;;  %v175_v7 = vadd.f32 %v174_v59, %v172_v56  ;;  %v157_v31 = vadd.f32 %v156_v16, %v113_v11 }
  0x59   :  { %s605_s13 = sld [smem:[#allocation7 + $0xc]]  ;;  %v183_v57 = vmul.f32 %v182_v45, %v536_v0  ;;  %v185_v60 = vstv %s576_s15  ;;  %v167_v35 = vmul.f32 %v166_v21, %v165_v20  ;;  %s461_s15 = smov [#allocation11]  }
  0x5a   :  { %s609_s23 = sld [smem:[#allocation9 + $0xd]]  ;;  %v176_v23 = vmax.f32 %v175_v7, 0.0  ;;  %v199_v36 = vstv %s582_s17  ;;  %s300_s17 = sshll.u32 %s461_s15, 4  ;;  %s301_s17 = int_to_ptr.vmem [resolvable:$true] %s300_s17 }
  0x5b   :  { %s612_s16 = sld [smem:[#allocation3 + $0xd]]  ;;  %v193_v53 = vstv %s586_s10  ;;  %v186_v8 = vadd.f32 %v185_v60, %v183_v57  ;;  %v168_v51 = vadd.f32 %v167_v35, %v124_v15  ;;  %s429_s10 = scalar_lea.vmem %s301_s17, 128 }
  0x5c   :  { %s616_s18 = sld [smem:[#allocation7 + $0xd]]  ;;  %v194_v2 = vmul.f32 %v193_v53, %v536_v0  ;;  %v196_v6 = vstv %s593_s22  ;;  %v178_v39 = vmul.f32 %v177_v24, %v176_v23  ;;  %p430_p6 = scmp.ne.s32.totalorder %s301_s17, %s429_s10 }
  0x5d   :  { %s622_s21 = sld [smem:[#allocation9 + $0xe]]  ;;  %v187_v25 = vmax.f32 %v186_v8, 0.0  ;;  %v210_v42 = vstv %s597_s20  ;;  %p434_p7 = scmp.lt.s32.totalorder %s301_s17, %s301_s17 }
  0x5e   :  { %v204_v61 = vstv %s601_s3  ;;  %s627_s25 = sld [smem:[#allocation3 + $0xe]]  ;;  %v197_v17 = vadd.f32 %v196_v6, %v194_v2  ;;  %v179_v52 = vadd.f32 %v178_v39, %v135_v19  ;;  %p435_p8 = scmp.lt.s32.totalorder %s429_s10, %s429_s10 }
  0x5f   :  { %s631_s24 = sld [smem:[#allocation7 + $0xe]]  ;;  %v205_v9 = vmul.f32 %v204_v61, %v536_v0  ;;  %v207_v13 = vstv %s605_s13  ;;  %v189_v40 = vmul.f32 %v188_v28, %v187_v25 }
  0x60   :  { %s635_s26 = sld [smem:[#allocation9 + $0xf]]  ;;  %v198_v32 = vmax.f32 %v197_v17, 0.0  ;;  %v221_v44 = vstv %s609_s23  ;;  %p436_p9 = por %p435_p8, %p434_p7 }
  0x61   :  { %v215_v10 = vstv %s612_s16  ;;  %s639_s1 = sld [smem:[#allocation3 + $0xf]]  ;;  %v208_v26 = vadd.f32 %v207_v13, %v205_v9  ;;  %v190_v60 = vadd.f32 %v189_v40, %v146_v27 }
  0x62   :  { %v216_v14 = vmul.f32 %v215_v10, %v536_v0  ;;  %s643_s0 = sld [smem:[#allocation7 + $0xf]]  ;;  %v218_v18 = vstv %s616_s18  ;;  %v200_v47 = vmul.f32 %v199_v36, %v198_v32  ;;  %p437_p10 = pnand %p436_p9, %p430_p6 }
  0x63   :  { %s646_s27 = sld [smem:[#allocation9 + $0x10]]  ;;  %v209_v41 = vmax.f32 %v208_v26, 0.0  ;;  %v232_v62 = vstv %s622_s21 }
  0x64   :  { %v226_v22 = vstv %s627_s25  ;;  %s650_s28 = sld [smem:[#allocation3 + $0x10]]  ;;  %v219_v29 = vadd.f32 %v218_v18, %v216_v14  ;;  %v201_v61 = vadd.f32 %v200_v47, %v157_v31 }
  0x65   :  { %s653_s29 = sld [smem:[#allocation7 + $0x10]]  ;;  %v227_v30 = vmul.f32 %v226_v22, %v536_v0  ;;  %v229_v33 = vstv %s631_s24  ;;  %v211_v53 = vmul.f32 %v210_v42, %v209_v41 }
  0x66   :  { %s657_s30 = sld [smem:[#allocation9 + $0x11]]  ;;  %v220_v43 = vmax.f32 %v219_v29, 0.0  ;;  %v243_v1 = vstv %s635_s26 }
  0x67   :  { %v237_v34 = vstv %s639_s1  ;;  %s360_s6 = sld [smem:[#allocation3 + $0x11]]  ;;  %v230_v45 = vadd.f32 %v229_v33, %v227_v30  ;;  %v212_v9 = vadd.f32 %v211_v53, %v168_v51 }
  0x68   :  { %v238_v37 = vmul.f32 %v237_v34, %v536_v0  ;;  %v240_v38 = vstv %s643_s0  ;;  %s664_s7 = sld [smem:[#allocation7 + $0x11]]  ;;  %v222_v56 = vmul.f32 %v221_v44, %v220_v43 }
  0x69   :  { %s667_s8 = sld [smem:[#allocation9 + $0x12]]  ;;  %v231_v57 = vmax.f32 %v230_v45, 0.0  ;;  %v254_v5 = vstv %s646_s27 }
  0x6a   :  { %v248_v46 = vstv %s650_s28  ;;  %s363_s2 = sld [smem:[#allocation3 + $0x12]]  ;;  %v241_v48 = vadd.f32 %v240_v38, %v238_v37  ;;  %v223_v10 = vadd.f32 %v222_v56, %v179_v52 }
  0x6b   :  { %v249_v49 = vmul.f32 %v248_v46, %v536_v0  ;;  %v251_v50 = vstv %s653_s29  ;;  %s364_s9 = sld [smem:[#allocation7 + $0x12]]  ;;  %v233_v11 = vmul.f32 %v232_v62, %v231_v57 }
  0x6c   :  { %s366_s11 = sld [smem:[#allocation3 + $0x13]]  ;;  %v242_v63 = vmax.f32 %v241_v48, 0.0  ;;  %v265_v6 = vstv %s657_s30 }
  0x6d   :  { %v252_v54 = vadd.f32 %v251_v50, %v249_v49  ;;  %v259_v55 = vstv %s360_s6  ;;  %s367_s12 = sld [smem:[#allocation7 + $0x13]]  ;;  %v234_v22 = vadd.f32 %v233_v11, %v190_v60 }
  0x6e   :  { %v260_v58 = vmul.f32 %v259_v55, %v536_v0  ;;  %v262_v59 = vstv %s664_s7  ;;  %s676_s14 = sld [smem:[#allocation9 + $0x13]]  ;;  %v244_v13 = vmul.f32 %v243_v1, %v242_v63 }
  0x6f   :  { %v253_v2 = vmax.f32 %v252_v54, 0.0  ;;  %v276_v15 = vstv %s667_s8 }
  0x70   :  { %v263_v3 = vadd.f32 %v262_v59, %v260_v58  ;;  %v270_v4 = vstv %s363_s2  ;;  %v245_v26 = vadd.f32 %v244_v13, %v201_v61 }
  0x71   :  { %v271_v7 = vmul.f32 %v270_v4, %v536_v0  ;;  %v273_v8 = vstv %s364_s9  ;;  %v255_v17 = vmul.f32 %v254_v5, %v253_v2 }
  0x72   :  { %v264_v12 = vmax.f32 %v263_v3, 0.0  ;;  %v281_v16 = vstv %s366_s11 }
  0x73   :  { %v274_v14 = vadd.f32 %v273_v8, %v271_v7  ;;  %v282_v19 = vmul.f32 %v281_v16, %v536_v0  ;;  %v284_v20 = vstv %s367_s12  ;;  %v256_v27 = vadd.f32 %v255_v17, %v212_v9 }
  0x74   :  { %v266_v18 = vmul.f32 %v265_v6, %v264_v12  ;;  %v287_v25 = vstv %s676_s14 }
  0x75   :  { %v275_v21 = vmax.f32 %v274_v14, 0.0  ;;  %v285_v23 = vadd.f32 %v284_v20, %v282_v19 }
  0x76   :  { %v267_v28 = vadd.f32 %v266_v18, %v223_v10 }
  0x77   :  { %v277_v24 = vmul.f32 %v276_v15, %v275_v21  ;;  %v286_v29 = vmax.f32 %v285_v23, 0.0 }
  0x78   :  { %v290_v33 = vadd.f32 %v267_v28, %v256_v27 }
  0x79   :  { %v278_v30 = vadd.f32 %v277_v24, %v234_v22  ;;  %v288_v31 = vmul.f32 %v287_v25, %v286_v29 }
  0x7b   :  { %v289_v32 = vadd.f32 %v288_v31, %v245_v26 }
  0x7d   :  { %v291_v34 = vadd.f32 %v289_v32, %v278_v30 }
  0x7f   :  { %v292_v35 = vadd.f32 %v291_v34, %v290_v33 }
  0x81   :  { %293 = vst [vmem:[#allocation11] sm:$0x7f] %v292_v35 }
  0x82   :  { %440 = shalt.err (!%p437_p10)
}
  0x83   :  { %303 = dma.vmem_to_hbm [thread:$0]  %s301_s17, 128, %s693_s5, [#allocation5]  }
  0x84   :  { %455 = dma.done.wait [#allocation5], 128  }
  0x85   :  { %456 = vsyncadd [#allocation5], 4294967168 }
  0x86   :  { %307 = vsyncpa [#allocation4], 1 }
  0x87   :  { %308 = vsyncpa [#allocation5], 1 }
  0x88   :  { %309 = vsyncpa [#allocation6], 1 }
  0x89   :  { %310 = vsyncpa [#allocation8], 1 }

</bundles_post_ra>
